<compile_context>
chip_gen: v5e
topology: v5e:2x2
jax: 0.10.0
libtpu: 0.0.40
codegen_flags: <defaults>
</compile_context>

<pallas_src>
import jax
import jax.numpy as jnp
from jax.experimental import pallas as pl
from jax.experimental.pallas import tpu as pltpu


# ----------------------------------------------------------------------------
# Fused kernel: (bb, nt, C, HW) --mean--> (bb, C) --MLP--> (bb, ncp)
# grid = (bb tiles [parallel], C tiles [arbitrary], nt tiles [arbitrary, innermost])
# ----------------------------------------------------------------------------
def _make_osbp_kernel(scale, c_tile, n_c):
    def kernel(f_ref, w1_ref, b1_ref, w2_ref, b2_ref, w3_ref, b3_ref,
               o_ref, acc_ref):
        ci = pl.program_id(1)          # channel-tile index      (arbitrary)
        ji = pl.program_id(2)          # num_segments-tile index (arbitrary, innermost)

        # Reduce nt on the VPU first (pure vreg-wise adds), then one cross-lane XLU
        # reduce over HW per channel row; only a (bb_tile, c_tile) partial is carried.
        x = f_ref[...].astype(jnp.float32)            # (bb_tile, nt_tile, c_tile, HW)
        psum = jnp.sum(jnp.sum(x, axis=1), axis=-1)   # (bb_tile, c_tile)

        if n_c == 1:
            @pl.when(ji == 0)
            def _():
                acc_ref[...] = psum

            @pl.when(ji > 0)
            def _():
                acc_ref[...] = acc_ref[...] + psum
        else:
            # Static lane slices of one contiguous (bb_tile, C) accumulator: the MLP
            # below sees ff lane-dense and contiguous, no concatenate / relayout.
            for k in range(n_c):
                sl = slice(k * c_tile, (k + 1) * c_tile)

                @pl.when(jnp.logical_and(ci == k, ji == 0))
                def _(sl=sl):
                    acc_ref[:, sl] = psum

                @pl.when(jnp.logical_and(ci == k, ji > 0))
                def _(sl=sl):
                    acc_ref[:, sl] = acc_ref[:, sl] + psum

        last = jnp.logical_and(ci == pl.num_programs(1) - 1,
                               ji == pl.num_programs(2) - 1)

        @pl.when(last)
        def _finalize():
            ff = acc_ref[...] * scale                 # mean = sum * 1/(nt*HW)

            # ffn_osbp: act_first ReLU -> Linear(C,C) -> ReLU -> Linear(C,C) -> Linear(C,nc)
            # bf16 weight stream, f32 elementwise + accumulation.
            h = jnp.maximum(ff, 0.0)
            h = jnp.dot(h.astype(w1_ref.dtype), w1_ref[...],
                        preferred_element_type=jnp.float32) + b1_ref[...]
            h = jnp.maximum(h, 0.0)
            h = jnp.dot(h.astype(w2_ref.dtype), w2_ref[...],
                        preferred_element_type=jnp.float32) + b2_ref[...]
            out = jnp.dot(h.astype(w3_ref.dtype), w3_ref[...],
                          preferred_element_type=jnp.float32) + b3_ref[...]
            o_ref[0] = out.astype(o_ref.dtype)        # one lane-dense store per bb tile

    return kernel


# ----------------------------------------------------------------------------
# Tiling / VMEM heuristics
# ----------------------------------------------------------------------------
_LANE = lambda n: ((n + 127) // 128) * 128
_SUB8 = lambda n: ((n + 7) // 8) * 8


def _sub_pad(n, itemsize):
    m = {4: 8, 2: 16, 1: 32}.get(itemsize, 8)
    return ((n + m - 1) // m) * m


def _vmem_cap_bytes():
    """0.75 * physical VMEM per TensorCore (conservative 64 MiB fallback)."""
    cap = 64 << 20
    try:
        cap = int(getattr(pltpu.get_tpu_info(), "vmem_capacity_bytes", cap))
    except Exception:
        pass
    return (3 * cap) // 4


def _largest_divisor_leq(n, cap):
    cap = max(1, min(cap, n))
    for d in range(cap, 0, -1):
        if n % d == 0:
            return d
    return 1


def _resident_bytes(bb_tile, C, ncp):
    """VMEM that stays live for the whole call (weights single-buffered)."""
    w = 2 * (2 * _SUB8(C) * _LANE(C) + _SUB8(C) * _LANE(ncp))       # bf16 W1, W2, W3p
    b = 4 * 3 * 8 * _LANE(max(C, ncp))                              # f32 biases (generous)
    acc = 4 * _SUB8(bb_tile) * _LANE(C)                             # f32 accumulator
    out = 2 * 4 * 8 * _LANE(ncp)                                    # f32 out block (x2)
    return w + b + acc + out


def _pick_tiles(bb, nt, C, HW, ncp, f_itemsize, vmem_cap):
    # bb tile: a divisor of bb (so no partial blocks anywhere) giving >= 2 steps on the
    # leading "parallel" axis whenever bb >= 2 (v7x megacore); bb is a leading block dim
    # of the f stream, so small values cost nothing in sublane/lane density.
    bb_tile = _largest_divisor_leq(bb, 8 if bb > 8 else bb - 1) if bb >= 2 else 1

    headroom = 8 << 20
    avail = max(vmem_cap - _resident_bytes(bb_tile, C, ncp) - headroom, 2 << 20)
    block_budget = avail // 2                    # the f stream is double-buffered

    # candidate channel tiles: full C, or any 128-multiple divisor of C
    cands = sorted({C} | {d for d in range(128, C, 128) if C % d == 0}, reverse=True)

    def padded(c_t, nt_t):
        return bb_tile * nt_t * _sub_pad(c_t, f_itemsize) * _LANE(HW) * f_itemsize

    best = None   # prefer configs that fit the budget, then maximal useful bytes / step
    for c_t in cands:
        nt_t = nt
        while nt_t > 1 and (nt % nt_t or padded(c_t, nt_t) > block_budget):
            nt_t -= 1
        fits = padded(c_t, nt_t) <= block_budget
        score = (1, bb_tile * nt_t * c_t * HW) if fits else (0, -padded(c_t, nt_t))
        if best is None or score > best[0]:
            best = (score, c_t, nt_t)
    _, c_tile, nt_tile = best
    return bb_tile, nt_tile, c_tile


def _vmem_limit_bytes(bb_tile, nt_tile, c_tile, HW, C, ncp, f_itemsize,
                      n_weight_buffers, vmem_cap):
    f_blk = bb_tile * nt_tile * _sub_pad(c_tile, f_itemsize) * _LANE(HW) * f_itemsize
    est = 2 * f_blk + n_weight_buffers * _resident_bytes(bb_tile, C, ncp) + (8 << 20)
    return int(min(max(est, 16 << 20), vmem_cap))


# ----------------------------------------------------------------------------
# pallas_call wrapper
# ----------------------------------------------------------------------------
def _osbp_pallas(f_r, w1, b1, w2, b2, w3p, b3p, tile_override=None):
    bb, nt, C, HW = f_r.shape
    ncp = w3p.shape[1]
    f_itemsize = jnp.dtype(f_r.dtype).itemsize
    vmem_cap = _vmem_cap_bytes()

    if tile_override is None:
        bb_tile, nt_tile, c_tile = _pick_tiles(bb, nt, C, HW, ncp, f_itemsize, vmem_cap)
    else:
        bb_tile, nt_tile, c_tile = tile_override

    assert bb % bb_tile == 0 and nt % nt_tile == 0 and C % c_tile == 0
    n_bb, n_c, n_t = bb // bb_tile, C // c_tile, nt // nt_tile
    assert n_c == 1 or c_tile % 128 == 0            # lane-aligned accumulator slices
    scale = 1.0 / float(nt * HW)

    kernel = _make_osbp_kernel(scale, c_tile, n_c)

    def build(single_buffer_weights):
        def fixed(shape):
            imap = lambda i, c, j: (0,) * len(shape)
            if single_buffer_weights:
                # Loop-invariant: one VMEM copy, DMA'd once (no useless double buffer).
                return pl.BlockSpec(shape, imap, pipeline_mode=pl.Buffered(1))
            return pl.BlockSpec(shape, imap)

        n_w_buf = 1 if single_buffer_weights else 2
        return pl.pallas_call(
            kernel,
            out_shape=jax.ShapeDtypeStruct((n_bb, bb_tile, ncp), jnp.float32),
            grid_spec=pltpu.PrefetchScalarGridSpec(
                num_scalar_prefetch=0,
                grid=(n_bb, n_c, n_t),
                in_specs=[
                    pl.BlockSpec((bb_tile, nt_tile, c_tile, HW),
                                 lambda i, c, j: (i, j, c, 0)),
                    fixed((C, C)),   fixed((1, C)),      # W1 (bf16), b1 (f32)
                    fixed((C, C)),   fixed((1, C)),      # W2 (bf16), b2 (f32)
                    fixed((C, ncp)), fixed((1, ncp)),    # W3 padded (bf16), b3 padded (f32)
                ],
                # Last two block dims equal the array dims -> layout-legal for any bb_tile,
                # lane-dense, written exactly once per bb tile.
                out_specs=pl.BlockSpec((1, bb_tile, ncp), lambda i, c, j: (i, 0, 0)),
                scratch_shapes=[pltpu.VMEM((bb_tile, C), jnp.float32)],
            ),
            compiler_params=pltpu.CompilerParams(
                dimension_semantics=("parallel", "arbitrary", "arbitrary"),
                vmem_limit_bytes=_vmem_limit_bytes(bb_tile, nt_tile, c_tile, HW, C, ncp,
                                                   f_itemsize, n_w_buf, vmem_cap),
            ),
        )

    args = (f_r, w1, b1, w2, b2, w3p, b3p)
    try:
        out = build(True)(*args)
        out = jax.block_until_ready(out)   # surface any lowering/compile issue here
    except Exception:
        # pipeline_mode=pl.Buffered(1) unsupported on this jax version: fall back to the
        # default double-buffered (still single-DMA) constant-index weight specs.
        out = build(False)(*args)
    return out


# ----------------------------------------------------------------------------
# Wrappers
# ----------------------------------------------------------------------------
def prepare_params(params, num_classes):
    """One-time (outside the serving loop): cast matmul weights to bf16 and pad the
    classifier head to a 128-lane multiple so the final store is unmasked."""
    w1, b1, w2, b2, w3, b3 = params
    C = w1.shape[0]
    ncp = ((num_classes + 127) // 128) * 128
    w3p = jnp.zeros((C, ncp), jnp.float32).at[:, :num_classes].set(w3)
    b3p = jnp.zeros((1, ncp), jnp.float32).at[:, :num_classes].set(b3)
    return (w1.astype(jnp.bfloat16), b1.astype(jnp.float32),
            w2.astype(jnp.bfloat16), b2.astype(jnp.float32),
            w3p.astype(jnp.bfloat16), b3p.astype(jnp.float32), num_classes)


def osbp_forward(f, prepared_params, num_segments, tile_override=None):
    """OSBP.forward (inference / as_head=False): returns (f, cls_score).
    GradReverse is identity in the forward pass; dropout is identity at inference.
    `f` may be float32 or bfloat16 (bf16 halves the dominant HBM feature read)."""
    w1, b1, w2, b2, w3p, b3p, num_classes = prepared_params
    B, C, H, W = f.shape
    bb = B // num_segments
    f_r = f.reshape(bb, num_segments, C, H * W)      # contiguous view, no data movement
    cls_padded = _osbp_pallas(f_r, w1, b1, w2, b2, w3p, b3p, tile_override)
    cls = cls_padded.reshape(-1, cls_padded.shape[-1])[:bb, :num_classes]
    return f, cls


def init_params(key, in_channels, num_classes, init_std=0.001):
    ks = jax.random.split(key, 6)
    w1 = init_std * jax.random.normal(ks[0], (in_channels, in_channels), jnp.float32)
    b1 = init_std * jax.random.normal(ks[1], (1, in_channels), jnp.float32)
    w2 = init_std * jax.random.normal(ks[2], (in_channels, in_channels), jnp.float32)
    b2 = init_std * jax.random.normal(ks[3], (1, in_channels), jnp.float32)
    w3 = init_std * jax.random.normal(ks[4], (in_channels, num_classes), jnp.float32)
    b3 = init_std * jax.random.normal(ks[5], (1, num_classes), jnp.float32)
    return (w1, b1, w2, b2, w3, b3)


def _reference(f, params, num_segments):
    # Pure-JAX reference mirroring the kernel numerics (f32 pooling, bf16 weight stream,
    # f32 accumulation).
    w1, b1, w2, b2, w3, b3 = params
    f = f.astype(jnp.float32)
    B, C, H, W = f.shape
    bb = B // num_segments
    ff = jnp.mean(f.reshape(bb, num_segments, C, H * W), axis=(1, 3))
    mm = lambda a, w: jnp.dot(a.astype(jnp.bfloat16), w.astype(jnp.bfloat16),
                              preferred_element_type=jnp.float32)
    h = mm(jnp.maximum(ff, 0.0), w1) + b1
    h = mm(jnp.maximum(h, 0.0), w2) + b2
    return mm(h, w3) + b3


if __name__ == "__main__":
    key = jax.random.PRNGKey(0)
    k_f, k_p, k_f2, k_p2 = jax.random.split(key, 4)

    # --- test 1: small shapes, heuristic tiling (n_bb = 2 parallel steps) ---
    in_channels, num_classes, num_segments, bb, H, W = 32, 5, 4, 2, 8, 8
    f = jax.random.normal(k_f, (bb * num_segments, in_channels, H, W), jnp.float32)
    params = init_params(k_p, in_channels, num_classes)
    prepared = prepare_params(params, num_classes)

    f_out, cls_score = osbp_forward(f, prepared, num_segments)
    jax.block_until_ready((f_out, cls_score))
    ref = _reference(f, params, num_segments)
    assert f_out.shape == f.shape
    assert cls_score.shape == (bb, num_classes)
    assert jnp.allclose(cls_score, ref, atol=1e-4, rtol=1e-3), \
        float(jnp.max(jnp.abs(cls_score - ref)))

    # --- test 2: tiled-reduction path (n_bb=2, n_c=2, n_t=3) with odd H*W ---
    c2, nc2, ns2, bb2, H2, W2 = 256, 3, 6, 4, 5, 5
    f2 = jax.random.normal(k_f2, (bb2 * ns2, c2, H2, W2), jnp.float32)
    params2 = init_params(k_p2, c2, nc2)
    prepared2 = prepare_params(params2, nc2)
    _, cls2 = osbp_forward(f2, prepared2, ns2,
                           tile_override=(2, 2, 128))   # (bb_tile, nt_tile, c_tile)
    jax.block_until_ready(cls2)
    ref2 = _reference(f2, params2, ns2)
    assert cls2.shape == (bb2, nc2)
    assert jnp.allclose(cls2, ref2, atol=1e-4, rtol=1e-3), \
        float(jnp.max(jnp.abs(cls2 - ref2)))

    # --- test 3: bf16 feature stream (halves the dominant HBM read) ---
    f3 = f.astype(jnp.bfloat16)
    _, cls3 = osbp_forward(f3, prepared, num_segments)
    jax.block_until_ready(cls3)
    ref3 = _reference(f3, params, num_segments)
    assert cls3.shape == (bb, num_classes)
    assert jnp.allclose(cls3, ref3, atol=5e-4, rtol=5e-3), \
        float(jnp.max(jnp.abs(cls3 - ref3)))

    print("KERNEL_OK")
</pallas_src>

<mosaic_0001>
module attributes {stable_mosaic.version = 11 : i64} {
  func.func @kernel(%arg0: i32, %arg1: i32, %arg2: i32, %arg3: memref<1x4x32x64xf32, #tpu.memory_space<vmem>>, %arg4: memref<32x32xbf16, #tpu.memory_space<vmem>>, %arg5: memref<1x32xf32, #tpu.memory_space<vmem>>, %arg6: memref<32x32xbf16, #tpu.memory_space<vmem>>, %arg7: memref<1x32xf32, #tpu.memory_space<vmem>>, %arg8: memref<32x128xbf16, #tpu.memory_space<vmem>>, %arg9: memref<1x128xf32, #tpu.memory_space<vmem>>, %arg10: memref<1x1x128xf32, #tpu.memory_space<vmem>>, %arg11: memref<1x32xf32, #tpu.memory_space<vmem>>) attributes {dimension_semantics = [#tpu.dimension_semantics<parallel>, #tpu.dimension_semantics<arbitrary>, #tpu.dimension_semantics<arbitrary>], iteration_bounds = array<i64: 2, 1, 1>, scalar_prefetch = 0 : i64, scratch_operands = 1 : i64, tpu.core_type = #tpu.core_type<tc>, window_params = [{transform_indices = @transform_0, window_bounds = array<i64: 1, 4, 32, 64>}, {pipeline_mode = #tpu.pipeline_mode<synchronous>, transform_indices = @transform_1, window_bounds = array<i64: 32, 32>}, {pipeline_mode = #tpu.pipeline_mode<synchronous>, transform_indices = @transform_2, window_bounds = array<i64: 1, 32>}, {pipeline_mode = #tpu.pipeline_mode<synchronous>, transform_indices = @transform_3, window_bounds = array<i64: 32, 32>}, {pipeline_mode = #tpu.pipeline_mode<synchronous>, transform_indices = @transform_4, window_bounds = array<i64: 1, 32>}, {pipeline_mode = #tpu.pipeline_mode<synchronous>, transform_indices = @transform_5, window_bounds = array<i64: 32, 128>}, {pipeline_mode = #tpu.pipeline_mode<synchronous>, transform_indices = @transform_6, window_bounds = array<i64: 1, 128>}, {transform_indices = @transform_7, window_bounds = array<i64: 1, 1, 128>}]} {
    %c0 = arith.constant 0 : index
    %c0_0 = arith.constant 0 : index
    %c0_1 = arith.constant 0 : index
    %c0_2 = arith.constant 0 : index
    %0 = vector.load %arg3[%c0, %c0_0, %c0_1, %c0_2] : memref<1x4x32x64xf32, #tpu.memory_space<vmem>>, vector<1x4x32x64xf32>
    %cst = arith.constant dense<0.000000e+00> : vector<1x32x64xf32>
    %1 = vector.multi_reduction <add>, %0, %cst [1] : vector<1x4x32x64xf32> to vector<1x32x64xf32>
    %cst_3 = arith.constant dense<0.000000e+00> : vector<1x32xf32>
    %2 = vector.multi_reduction <add>, %1, %cst_3 [2] : vector<1x32x64xf32> to vector<1x32xf32>
    %c0_i32 = arith.constant 0 : i32
    %3 = arith.cmpi eq, %arg2, %c0_i32 : i32
    %4 = arith.extui %3 : i1 to i32
    %c0_i32_4 = arith.constant 0 : i32
    %5 = arith.cmpi ne, %4, %c0_i32_4 : i32
    scf.if %5 {
      %c0_10 = arith.constant 0 : index
      %c0_11 = arith.constant 0 : index
      %14 = vector.load %arg11[%c0_10, %c0_11] : memref<1x32xf32, #tpu.memory_space<vmem>>, vector<1x32xf32>
      tpu.vector_store %arg11[%c0_10, %c0_11], %2 {strides = array<i32>} : memref<1x32xf32, #tpu.memory_space<vmem>>, vector<1x32xf32>,
    } else {
    }
    %c0_i32_5 = arith.constant 0 : i32
    %6 = arith.cmpi sgt, %arg2, %c0_i32_5 : i32
    %7 = arith.extui %6 : i1 to i32
    %c0_i32_6 = arith.constant 0 : i32
    %8 = arith.cmpi ne, %7, %c0_i32_6 : i32
    scf.if %8 {
      %c0_10 = arith.constant 0 : index
      %c0_11 = arith.constant 0 : index
      %14 = vector.load %arg11[%c0_10, %c0_11] : memref<1x32xf32, #tpu.memory_space<vmem>>, vector<1x32xf32>
      %15 = arith.addf %14, %2 : vector<1x32xf32>
      %c0_12 = arith.constant 0 : index
      %c0_13 = arith.constant 0 : index
      %16 = vector.load %arg11[%c0_12, %c0_13] : memref<1x32xf32, #tpu.memory_space<vmem>>, vector<1x32xf32>
      tpu.vector_store %arg11[%c0_12, %c0_13], %15 {strides = array<i32>} : memref<1x32xf32, #tpu.memory_space<vmem>>, vector<1x32xf32>,
    } else {
    }
    %c0_i32_7 = arith.constant 0 : i32
    %9 = arith.cmpi eq, %arg1, %c0_i32_7 : i32
    %c0_i32_8 = arith.constant 0 : i32
    %10 = arith.cmpi eq, %arg2, %c0_i32_8 : i32
    %11 = arith.andi %9, %10 : i1
    %12 = arith.extui %11 : i1 to i32
    %c0_i32_9 = arith.constant 0 : i32
    %13 = arith.cmpi ne, %12, %c0_i32_9 : i32
    scf.if %13 {
      %c0_10 = arith.constant 0 : index
      %c0_11 = arith.constant 0 : index
      %14 = vector.load %arg11[%c0_10, %c0_11] : memref<1x32xf32, #tpu.memory_space<vmem>>, vector<1x32xf32>
      %cst_12 = arith.constant 3.906250e-03 : f32
      %15 = vector.broadcast %cst_12 : f32 to vector<1x32xf32>
      %16 = arith.mulf %14, %15 : vector<1x32xf32>
      %cst_13 = arith.constant 0.000000e+00 : f32
      %17 = vector.broadcast %cst_13 : f32 to vector<1x32xf32>
      %18 = arith.maximumf %16, %17 : vector<1x32xf32>
      %19 = arith.truncf %18 : vector<1x32xf32> to vector<1x32xbf16>
      %c0_14 = arith.constant 0 : index
      %c0_15 = arith.constant 0 : index
      %20 = vector.load %arg4[%c0_14, %c0_15] : memref<32x32xbf16, #tpu.memory_space<vmem>>, vector<32x32xbf16>
      %cst_16 = arith.constant dense<0.000000e+00> : vector<1x32xf32>
      %21 = tpu.matmul %19, %20, %cst_16 {dimension_numbers = #tpu.dot_dimension_numbers<[1], [0], [0], [1], [0, 0, 1, 1], [], []>} : vector<1x32xbf16>, vector<32x32xbf16>, vector<1x32xf32> -> vector<1x32xf32>
      %c0_17 = arith.constant 0 : index
      %c0_18 = arith.constant 0 : index
      %22 = vector.load %arg5[%c0_17, %c0_18] : memref<1x32xf32, #tpu.memory_space<vmem>>, vector<1x32xf32>
      %23 = arith.addf %21, %22 : vector<1x32xf32>
      %cst_19 = arith.constant 0.000000e+00 : f32
      %24 = vector.broadcast %cst_19 : f32 to vector<1x32xf32>
      %25 = arith.maximumf %23, %24 : vector<1x32xf32>
      %26 = arith.truncf %25 : vector<1x32xf32> to vector<1x32xbf16>
      %c0_20 = arith.constant 0 : index
      %c0_21 = arith.constant 0 : index
      %27 = vector.load %arg6[%c0_20, %c0_21] : memref<32x32xbf16, #tpu.memory_space<vmem>>, vector<32x32xbf16>
      %cst_22 = arith.constant dense<0.000000e+00> : vector<1x32xf32>
      %28 = tpu.matmul %26, %27, %cst_22 {dimension_numbers = #tpu.dot_dimension_numbers<[1], [0], [0], [1], [0, 0, 1, 1], [], []>} : vector<1x32xbf16>, vector<32x32xbf16>, vector<1x32xf32> -> vector<1x32xf32>
      %c0_23 = arith.constant 0 : index
      %c0_24 = arith.constant 0 : index
      %29 = vector.load %arg7[%c0_23, %c0_24] : memref<1x32xf32, #tpu.memory_space<vmem>>, vector<1x32xf32>
      %30 = arith.addf %28, %29 : vector<1x32xf32>
      %31 = arith.truncf %30 : vector<1x32xf32> to vector<1x32xbf16>
      %c0_25 = arith.constant 0 : index
      %c0_26 = arith.constant 0 : index
      %32 = vector.load %arg8[%c0_25, %c0_26] : memref<32x128xbf16, #tpu.memory_space<vmem>>, vector<32x128xbf16>
      %cst_27 = arith.constant dense<0.000000e+00> : vector<1x128xf32>
      %33 = tpu.matmul %31, %32, %cst_27 {dimension_numbers = #tpu.dot_dimension_numbers<[1], [0], [0], [1], [0, 0, 1, 1], [], []>} : vector<1x32xbf16>, vector<32x128xbf16>, vector<1x128xf32> -> vector<1x128xf32>
      %c0_28 = arith.constant 0 : index
      %c0_29 = arith.constant 0 : index
      %34 = vector.load %arg9[%c0_28, %c0_29] : memref<1x128xf32, #tpu.memory_space<vmem>>, vector<1x128xf32>
      %35 = arith.addf %33, %34 : vector<1x128xf32>
      %c0_30 = arith.constant 0 : index
      %c0_31 = arith.constant 0 : index
      %c0_32 = arith.constant 0 : index
      %36 = vector.load %arg10[%c0_30, %c0_31, %c0_32] : memref<1x1x128xf32, #tpu.memory_space<vmem>>, vector<1x1x128xf32>
      %37 = vector.shape_cast %36 : vector<1x1x128xf32> to vector<1x128xf32>
      %38 = vector.shape_cast %35 : vector<1x128xf32> to vector<1x1x128xf32>
      tpu.vector_store %arg10[%c0_30, %c0_31, %c0_32], %38 {strides = array<i32>} : memref<1x1x128xf32, #tpu.memory_space<vmem>>, vector<1x1x128xf32>,
    } else {
    }
    return
  }
  func.func @transform_0(%arg0: i32, %arg1: i32, %arg2: i32) -> (i32, i32, i32, i32) {
    %c0_i32 = arith.constant 0 : i32
    %c0_i32_0 = arith.constant 0 : i32
    return %arg0, %arg2, %arg1, %c0_i32 : i32, i32, i32, i32
  }
  func.func @transform_1(%arg0: i32, %arg1: i32, %arg2: i32) -> (i32, i32) {
    %c0_i32 = arith.constant 0 : i32
    %c0_i32_0 = arith.constant 0 : i32
    %c0_i32_1 = arith.constant 0 : i32
    return %c0_i32, %c0_i32_0 : i32, i32
  }
  func.func @transform_2(%arg0: i32, %arg1: i32, %arg2: i32) -> (i32, i32) {
    %c0_i32 = arith.constant 0 : i32
    %c0_i32_0 = arith.constant 0 : i32
    %c0_i32_1 = arith.constant 0 : i32
    return %c0_i32, %c0_i32_0 : i32, i32
  }
  func.func @transform_3(%arg0: i32, %arg1: i32, %arg2: i32) -> (i32, i32) {
    %c0_i32 = arith.constant 0 : i32
    %c0_i32_0 = arith.constant 0 : i32
    %c0_i32_1 = arith.constant 0 : i32
    return %c0_i32, %c0_i32_0 : i32, i32
  }
  func.func @transform_4(%arg0: i32, %arg1: i32, %arg2: i32) -> (i32, i32) {
    %c0_i32 = arith.constant 0 : i32
    %c0_i32_0 = arith.constant 0 : i32
    %c0_i32_1 = arith.constant 0 : i32
    return %c0_i32, %c0_i32_0 : i32, i32
  }
  func.func @transform_5(%arg0: i32, %arg1: i32, %arg2: i32) -> (i32, i32) {
    %c0_i32 = arith.constant 0 : i32
    %c0_i32_0 = arith.constant 0 : i32
    %c0_i32_1 = arith.constant 0 : i32
    return %c0_i32, %c0_i32_0 : i32, i32
  }
  func.func @transform_6(%arg0: i32, %arg1: i32, %arg2: i32) -> (i32, i32) {
    %c0_i32 = arith.constant 0 : i32
    %c0_i32_0 = arith.constant 0 : i32
    %c0_i32_1 = arith.constant 0 : i32
    return %c0_i32, %c0_i32_0 : i32, i32
  }
  func.func @transform_7(%arg0: i32, %arg1: i32, %arg2: i32) -> (i32, i32, i32) {
    %c0_i32 = arith.constant 0 : i32
    %c0_i32_0 = arith.constant 0 : i32
    %c0_i32_1 = arith.constant 0 : i32
    return %arg0, %c0_i32, %c0_i32_0 : i32, i32, i32
  }
}

module attributes {stable_mosaic.version = 11 : i64} {
  func.func @kernel(%arg0: i32, %arg1: i32, %arg2: i32, %arg3: memref<1x4x32x64xf32, #tpu.memory_space<vmem>>, %arg4: memref<32x32xbf16, #tpu.memory_space<vmem>>, %arg5: memref<1x32xf32, #tpu.memory_space<vmem>>, %arg6: memref<32x32xbf16, #tpu.memory_space<vmem>>, %arg7: memref<1x32xf32, #tpu.memory_space<vmem>>, %arg8: memref<32x128xbf16, #tpu.memory_space<vmem>>, %arg9: memref<1x128xf32, #tpu.memory_space<vmem>>, %arg10: memref<1x1x128xf32, #tpu.memory_space<vmem>>, %arg11: memref<1x32xf32, #tpu.memory_space<vmem>>) attributes {dimension_semantics = [#tpu.dimension_semantics<parallel>, #tpu.dimension_semantics<arbitrary>, #tpu.dimension_semantics<arbitrary>], iteration_bounds = array<i64: 2, 1, 1>, scalar_prefetch = 0 : i64, scratch_operands = 1 : i64, tpu.core_type = #tpu.core_type<tc>, window_params = [{transform_indices = @transform_0, window_bounds = array<i64: 1, 4, 32, 64>}, {pipeline_mode = #tpu.pipeline_mode<synchronous>, transform_indices = @transform_1, window_bounds = array<i64: 32, 32>}, {pipeline_mode = #tpu.pipeline_mode<synchronous>, transform_indices = @transform_2, window_bounds = array<i64: 1, 32>}, {pipeline_mode = #tpu.pipeline_mode<synchronous>, transform_indices = @transform_3, window_bounds = array<i64: 32, 32>}, {pipeline_mode = #tpu.pipeline_mode<synchronous>, transform_indices = @transform_4, window_bounds = array<i64: 1, 32>}, {pipeline_mode = #tpu.pipeline_mode<synchronous>, transform_indices = @transform_5, window_bounds = array<i64: 32, 128>}, {pipeline_mode = #tpu.pipeline_mode<synchronous>, transform_indices = @transform_6, window_bounds = array<i64: 1, 128>}, {transform_indices = @transform_7, window_bounds = array<i64: 1, 1, 128>}]} {
    %c0 = arith.constant 0 : index
    %c0_0 = arith.constant 0 : index
    %c0_1 = arith.constant 0 : index
    %c0_2 = arith.constant 0 : index
    %0 = vector.load %arg3[%c0, %c0_0, %c0_1, %c0_2] : memref<1x4x32x64xf32, #tpu.memory_space<vmem>>, vector<1x4x32x64xf32>
    %cst = arith.constant dense<0.000000e+00> : vector<1x32x64xf32>
    %1 = vector.multi_reduction <add>, %0, %cst [1] : vector<1x4x32x64xf32> to vector<1x32x64xf32>
    %cst_3 = arith.constant dense<0.000000e+00> : vector<1x32xf32>
    %2 = vector.multi_reduction <add>, %1, %cst_3 [2] : vector<1x32x64xf32> to vector<1x32xf32>
    %c0_i32 = arith.constant 0 : i32
    %3 = arith.cmpi eq, %arg2, %c0_i32 : i32
    %4 = arith.extui %3 : i1 to i32
    %c0_i32_4 = arith.constant 0 : i32
    %5 = arith.cmpi ne, %4, %c0_i32_4 : i32
    scf.if %5 {
      %c0_10 = arith.constant 0 : index
      %c0_11 = arith.constant 0 : index
      %14 = vector.load %arg11[%c0_10, %c0_11] : memref<1x32xf32, #tpu.memory_space<vmem>>, vector<1x32xf32>
      tpu.vector_store %arg11[%c0_10, %c0_11], %2 {strides = array<i32>} : memref<1x32xf32, #tpu.memory_space<vmem>>, vector<1x32xf32>,
    } else {
    }
    %c0_i32_5 = arith.constant 0 : i32
    %6 = arith.cmpi sgt, %arg2, %c0_i32_5 : i32
    %7 = arith.extui %6 : i1 to i32
    %c0_i32_6 = arith.constant 0 : i32
    %8 = arith.cmpi ne, %7, %c0_i32_6 : i32
    scf.if %8 {
      %c0_10 = arith.constant 0 : index
      %c0_11 = arith.constant 0 : index
      %14 = vector.load %arg11[%c0_10, %c0_11] : memref<1x32xf32, #tpu.memory_space<vmem>>, vector<1x32xf32>
      %15 = arith.addf %14, %2 : vector<1x32xf32>
      %c0_12 = arith.constant 0 : index
      %c0_13 = arith.constant 0 : index
      %16 = vector.load %arg11[%c0_12, %c0_13] : memref<1x32xf32, #tpu.memory_space<vmem>>, vector<1x32xf32>
      tpu.vector_store %arg11[%c0_12, %c0_13], %15 {strides = array<i32>} : memref<1x32xf32, #tpu.memory_space<vmem>>, vector<1x32xf32>,
    } else {
    }
    %c0_i32_7 = arith.constant 0 : i32
    %9 = arith.cmpi eq, %arg1, %c0_i32_7 : i32
    %c0_i32_8 = arith.constant 0 : i32
    %10 = arith.cmpi eq, %arg2, %c0_i32_8 : i32
    %11 = arith.andi %9, %10 : i1
    %12 = arith.extui %11 : i1 to i32
    %c0_i32_9 = arith.constant 0 : i32
    %13 = arith.cmpi ne, %12, %c0_i32_9 : i32
    scf.if %13 {
      %c0_10 = arith.constant 0 : index
      %c0_11 = arith.constant 0 : index
      %14 = vector.load %arg11[%c0_10, %c0_11] : memref<1x32xf32, #tpu.memory_space<vmem>>, vector<1x32xf32>
      %cst_12 = arith.constant 3.906250e-03 : f32
      %15 = vector.broadcast %cst_12 : f32 to vector<1x32xf32>
      %16 = arith.mulf %14, %15 : vector<1x32xf32>
      %cst_13 = arith.constant 0.000000e+00 : f32
      %17 = vector.broadcast %cst_13 : f32 to vector<1x32xf32>
      %18 = arith.maximumf %16, %17 : vector<1x32xf32>
      %19 = arith.truncf %18 : vector<1x32xf32> to vector<1x32xbf16>
      %c0_14 = arith.constant 0 : index
      %c0_15 = arith.constant 0 : index
      %20 = vector.load %arg4[%c0_14, %c0_15] : memref<32x32xbf16, #tpu.memory_space<vmem>>, vector<32x32xbf16>
      %cst_16 = arith.constant dense<0.000000e+00> : vector<1x32xf32>
      %21 = tpu.matmul %19, %20, %cst_16 {dimension_numbers = #tpu.dot_dimension_numbers<[1], [0], [0], [1], [0, 0, 1, 1], [], []>} : vector<1x32xbf16>, vector<32x32xbf16>, vector<1x32xf32> -> vector<1x32xf32>
      %c0_17 = arith.constant 0 : index
      %c0_18 = arith.constant 0 : index
      %22 = vector.load %arg5[%c0_17, %c0_18] : memref<1x32xf32, #tpu.memory_space<vmem>>, vector<1x32xf32>
      %23 = arith.addf %21, %22 : vector<1x32xf32>
      %cst_19 = arith.constant 0.000000e+00 : f32
      %24 = vector.broadcast %cst_19 : f32 to vector<1x32xf32>
      %25 = arith.maximumf %23, %24 : vector<1x32xf32>
      %26 = arith.truncf %25 : vector<1x32xf32> to vector<1x32xbf16>
      %c0_20 = arith.constant 0 : index
      %c0_21 = arith.constant 0 : index
      %27 = vector.load %arg6[%c0_20, %c0_21] : memref<32x32xbf16, #tpu.memory_space<vmem>>, vector<32x32xbf16>
      %cst_22 = arith.constant dense<0.000000e+00> : vector<1x32xf32>
      %28 = tpu.matmul %26, %27, %cst_22 {dimension_numbers = #tpu.dot_dimension_numbers<[1], [0], [0], [1], [0, 0, 1, 1], [], []>} : vector<1x32xbf16>, vector<32x32xbf16>, vector<1x32xf32> -> vector<1x32xf32>
      %c0_23 = arith.constant 0 : index
      %c0_24 = arith.constant 0 : index
      %29 = vector.load %arg7[%c0_23, %c0_24] : memref<1x32xf32, #tpu.memory_space<vmem>>, vector<1x32xf32>
      %30 = arith.addf %28, %29 : vector<1x32xf32>
      %31 = arith.truncf %30 : vector<1x32xf32> to vector<1x32xbf16>
      %c0_25 = arith.constant 0 : index
      %c0_26 = arith.constant 0 : index
      %32 = vector.load %arg8[%c0_25, %c0_26] : memref<32x128xbf16, #tpu.memory_space<vmem>>, vector<32x128xbf16>
      %cst_27 = arith.constant dense<0.000000e+00> : vector<1x128xf32>
      %33 = tpu.matmul %31, %32, %cst_27 {dimension_numbers = #tpu.dot_dimension_numbers<[1], [0], [0], [1], [0, 0, 1, 1], [], []>} : vector<1x32xbf16>, vector<32x128xbf16>, vector<1x128xf32> -> vector<1x128xf32>
      %c0_28 = arith.constant 0 : index
      %c0_29 = arith.constant 0 : index
      %34 = vector.load %arg9[%c0_28, %c0_29] : memref<1x128xf32, #tpu.memory_space<vmem>>, vector<1x128xf32>
      %35 = arith.addf %33, %34 : vector<1x128xf32>
      %c0_30 = arith.constant 0 : index
      %c0_31 = arith.constant 0 : index
      %c0_32 = arith.constant 0 : index
      %36 = vector.load %arg10[%c0_30, %c0_31, %c0_32] : memref<1x1x128xf32, #tpu.memory_space<vmem>>, vector<1x1x128xf32>
      %37 = vector.shape_cast %36 : vector<1x1x128xf32> to vector<1x128xf32>
      %38 = vector.shape_cast %35 : vector<1x128xf32> to vector<1x1x128xf32>
      tpu.vector_store %arg10[%c0_30, %c0_31, %c0_32], %38 {strides = array<i32>} : memref<1x1x128xf32, #tpu.memory_space<vmem>>, vector<1x1x128xf32>,
    } else {
    }
    return
  }
  func.func @transform_0(%arg0: i32, %arg1: i32, %arg2: i32) -> (i32, i32, i32, i32) {
    %c0_i32 = arith.constant 0 : i32
    %c0_i32_0 = arith.constant 0 : i32
    return %arg0, %arg2, %arg1, %c0_i32 : i32, i32, i32, i32
  }
  func.func @transform_1(%arg0: i32, %arg1: i32, %arg2: i32) -> (i32, i32) {
    %c0_i32 = arith.constant 0 : i32
    %c0_i32_0 = arith.constant 0 : i32
    %c0_i32_1 = arith.constant 0 : i32
    return %c0_i32, %c0_i32_0 : i32, i32
  }
  func.func @transform_2(%arg0: i32, %arg1: i32, %arg2: i32) -> (i32, i32) {
    %c0_i32 = arith.constant 0 : i32
    %c0_i32_0 = arith.constant 0 : i32
    %c0_i32_1 = arith.constant 0 : i32
    return %c0_i32, %c0_i32_0 : i32, i32
  }
  func.func @transform_3(%arg0: i32, %arg1: i32, %arg2: i32) -> (i32, i32) {
    %c0_i32 = arith.constant 0 : i32
    %c0_i32_0 = arith.constant 0 : i32
    %c0_i32_1 = arith.constant 0 : i32
    return %c0_i32, %c0_i32_0 : i32, i32
  }
  func.func @transform_4(%arg0: i32, %arg1: i32, %arg2: i32) -> (i32, i32) {
    %c0_i32 = arith.constant 0 : i32
    %c0_i32_0 = arith.constant 0 : i32
    %c0_i32_1 = arith.constant 0 : i32
    return %c0_i32, %c0_i32_0 : i32, i32
  }
  func.func @transform_5(%arg0: i32, %arg1: i32, %arg2: i32) -> (i32, i32) {
    %c0_i32 = arith.constant 0 : i32
    %c0_i32_0 = arith.constant 0 : i32
    %c0_i32_1 = arith.constant 0 : i32
    return %c0_i32, %c0_i32_0 : i32, i32
  }
  func.func @transform_6(%arg0: i32, %arg1: i32, %arg2: i32) -> (i32, i32) {
    %c0_i32 = arith.constant 0 : i32
    %c0_i32_0 = arith.constant 0 : i32
    %c0_i32_1 = arith.constant 0 : i32
    return %c0_i32, %c0_i32_0 : i32, i32
  }
  func.func @transform_7(%arg0: i32, %arg1: i32, %arg2: i32) -> (i32, i32, i32) {
    %c0_i32 = arith.constant 0 : i32
    %c0_i32_0 = arith.constant 0 : i32
    %c0_i32_1 = arith.constant 0 : i32
    return %arg0, %c0_i32, %c0_i32_0 : i32, i32, i32
  }
}

</mosaic_0001>

<bundles_post_ra>
// kernel: tpu_custom_call.1
= control target key start
LH: loop header
LB: loop body
LE: loop exit
PB: predicated region body
PF: predicated region fallthrough
CT: control target
= control target key end

     0   :  { %s1441_s0 = inlined_call_operand.hbm [shape: f32[2,4,32,64], index: 0, kind: input, shape index: {}]   ;;  %s1442_s1 = inlined_call_operand.hbm [shape: bf16[32,32], index: 1, kind: input, shape index: {}]   ;;  %s1443_s2 = inlined_call_operand.vmem [shape: f32[1,32], index: 2, kind: input, shape index: {}]   ;;  %s1444_s3 = inlined_call_operand.hbm [shape: bf16[32,32], index: 3, kind: input, shape index: {}]   ;;  %s1445_s4 = inlined_call_operand.vmem [shape: f32[1,32], index: 4, kind: input, shape index: {}]   ;;  %s1446_s5 = inlined_call_operand.hbm [shape: bf16[32,128], index: 5, kind: input, shape index: {}]   ;;  %s1447_s6 = inlined_call_operand.vmem [shape: f32[1,128], index: 6, kind: input, shape index: {}]   ;;  %s1448_s7 = inlined_call_operand.hbm [shape: f32[2,1,128], index: 7, kind: output, shape index: {}]  }
   0x1   :  { %1452 = sst [smem:[#allocation18_spill]] %s1442_s1 }
   0x2   :  { %1453 = sst [smem:[#allocation19_spill]] %s1444_s3 }
   0x3   :  { %1454 = sst [smem:[#allocation20_spill]] %s1446_s5 }
   0x4   :  { %12 = vsyncpa [#allocation4], 0 }
   0x5   :  { %14 = vsyncpa [#allocation4 + $0x1], 0 }
   0x6   :  { %15 = vsyncpa [#allocation7], 0 }
   0x7   :  { %16 = vsyncpa [#allocation10], 0 }
   0x8   :  { %17 = vsyncpa [#allocation5], 0 }
   0x9   :  { %19 = vsyncpa [#allocation5 + $0x1], 0  ;;  %s1221_s24 = smov 0   ;;  %s1223_s25 = smov 0  }
   0xa   :  { %s1225_s26 = smov 0   ;;  %s1227_s27 = smov 0  }
   0xb   :  { %s1229_s28 = smov 0   ;;  %s1231_s29 = smov 0  }
   0xc LB: > { %1455 = sst [smem:[#allocation16_spill]] %s1172_s29  ;;  %s814_s30 = sadd.s32 4294967295, %s1172_s29   ;;  %s1172_s29 = sphi %s1231_s29, %s25_s29   ;;  %s1168_s28 = sphi %s1229_s28, %s1474_s28   ;;  %s1164_s27 = sphi %s1227_s27, %s1473_s27   ;;  %s1160_s26 = sphi %s1225_s26, %s1472_s26   ;;  %s1156_s25 = sphi %s1223_s25, %s1471_s25   ;;  %s1152_s24 = sphi %s1221_s24, %s1470_s24  }
   0xd   : > { %s815_s8 = sadd.s32 4294967294, %s1172_s29   ;;  %p68_p0 = scmp.ne.s32.totalorder %s1156_s25, %s1152_s24 }
   0xe   : > { %p1255_p1 = scmp.eq.s32.totalorder %s814_s30, 0  ;;  %p1259_p2 = scmp.eq.s32.totalorder %s814_s30, 1 }
   0xf   : > { %p224_p3 = scmp.eq.s32.totalorder %s815_s8, 1  ;;  %p816_p5 = scmp.ge.s32.totalorder %s1172_s29, 1 }
  0x10   : > { %p1265_p4 = por %p1255_p1, %p68_p0  ;;  %p231_p7 = scmp.lt.s32.totalorder %s1172_s29, 3 }
  0x11   : > { %p1270_p6 = por %p224_p3, %p68_p0  ;;  %s1460_s1 = sld [smem:[#allocation18_spill]] }
  0x12   : > { %p1278_p8 = pnand %p816_p5, %p231_p7  ;;  %s1174_s17 = smov [#allocation6]  }
  0x13   : > { %s244_s18 = sshll.u32 %s1174_s17, 4  ;;  %p820_p11 = scmp.ge.s32.totalorder %s1172_s29, 2  ;;  %s245_s18 = int_to_ptr.vmem [resolvable:$true] %s244_s18 }
  0x14   : > { %p881_p9 = pneg %p1278_p8  ;;  %s1463_s3 = sld [smem:[#allocation19_spill]] }
  0x15   : > { %s1175_s23 = smov 64   ;;  %s1176_s30 = smov 4  }
  0x16   : > { %p1286_p10 = pnand %p881_p9, %p1255_p1  ;;  %s1177_s8 = smov [#allocation8]  }
  0x17   : > { %s242_s15 = sshll.u32 %s1460_s1, 4  ;;  %s261_s13 = sshll.u32 %s1177_s8, 4  ;;  %s243_s15 = int_to_ptr.hbm [resolvable:$true] %s242_s15  ;;  %s262_s13 = int_to_ptr.vmem [resolvable:$true] %s261_s13 }
  0x18   : > { %884 = dma.hbm_to_vmem [thread:$0]  (!%p1286_p10), %s243_s15, 256, %s245_s18, [#allocation7], %s1175_s23, %s1175_s23, %s1176_s30  }
  0x19   : > { %s1464_s5 = sld [smem:[#allocation20_spill]]  ;;  %s1178_s20 = smov [#allocation9]  }
  0x1a   : > { %s259_s22 = sshll.u32 %s1463_s3, 4  ;;  %s278_s21 = sshll.u32 %s1178_s20, 4  ;;  %s260_s22 = int_to_ptr.hbm [resolvable:$true] %s259_s22  ;;  %s279_s21 = int_to_ptr.vmem [resolvable:$true] %s278_s21 }
  0x1b   : > { %887 = dma.hbm_to_vmem [thread:$0]  (!%p1286_p10), %s260_s22, 256, %s262_s13, [#allocation7], %s1175_s23, %s1175_s23, %s1176_s30  }
  0x1c   : > { %s44_s15 = sadd.s32 1, %s1168_s28  ;;  %s55_s18 = sadd.s32 1, %s1160_s26 }
  0x1d   : > { %p46_p12 = scmp.ge.s32.totalorder %s44_s15, 2  ;;  %p62_p13 = scmp.ne.s32.totalorder %s1160_s26, %s1156_s25 }
  0x1e   : > { %p63_p0 = scmp.eq.s32.totalorder %s1172_s29, 0  ;;  %p902_p7 = scmp.lt.s32.totalorder %s1172_s29, 2 }
  0x1f   : > { %s276_s1 = sshll.u32 %s1464_s5, 4  ;;  %s1476_s15 = smov (%p46_p12, %s44_s15), 0  ;;  %s277_s1 = int_to_ptr.hbm [resolvable:$true] %s276_s1 }
  0x20   : > { %890 = dma.hbm_to_vmem [thread:$0]  (!%p1286_p10), %s277_s1, 256, %s279_s21, [#allocation10], %s1175_s23, %s1175_s23, %s1176_s30  }
  0x21   : > { %1465 = sst [smem:[#allocation17_spill]] %s1476_s15  ;;  %p1310_p3 = por %p63_p0, %p62_p13 }
  0x22   : > { %p1316_p5 = por %p1259_p2, %p62_p13  ;;  %s48_s19 = ssub.s32 %s1168_s28, %s1476_s15 }
  0x23   : > { %p53_p9 = scmp.eq.s32.totalorder %s48_s19, 0  ;;  %s295_s1 = sand.u32 1, %s1160_s26  }
  0x24   : > { %s821_s23 = sshll.u32 %s295_s1, 7  ;;  %s858_s13 = sshll.u32 %s1168_s28, 7 }
  0x25   : > { %s1325_s30 = scalar_select %p53_p9, %s1160_s26, %s55_s18  }
  0x26   : > { %s309_s20 = scalar_lea.hbm %s1441_s0, %s858_s13  ;;  %s299_s21 = scalar_lea.vmem [#allocation3], %s821_s23 }
  0x27   : > { %s312_s3 = sshll.u32 %s299_s21, 4  ;;  %s310_s10 = sshll.u32 %s309_s20, 4  ;;  %s313_s3 = int_to_ptr.vmem [resolvable:$true] %s312_s3  ;;  %s311_s10 = int_to_ptr.hbm [resolvable:$true] %s310_s10 }
  0x28   : > { %p892_p2 = pnand %p902_p7, %p1310_p3  ;;  %s296_s5 = scalar_lea.sflag [#allocation4], %s295_s1 }
  0x29   : > { %s1179_s15 = smov 128   ;;  %s1180_s29 = smov 8  }
  0x2a   : > { %894 = dma.hbm_to_vmem [thread:$0]  (!%p892_p2), %s311_s10, 2048, %s313_s3, %s296_s5, %s1179_s15, %s1179_s15, %s1180_s29  }
  0x2b   : > { %324 = sbr.rel (%p1278_p8) target bundleno = 608 (0x260), region = 48  ;;  %s1336_s18 = sand.u32 (!%p1278_p8), 1, %s1156_s25  }
  0x2c   : > { %s825_s19 = sshll.u32 (!%p1278_p8), %s1336_s18, 7  ;;  %s327_s23 = scalar_lea.sflag (!%p1278_p8), [#allocation4], %s1336_s18 }
  0x2d   : > { %s1340_s13 = scalar_lea.vmem (!%p1278_p8), [#allocation3], %s825_s19 }
  0x30   : > { %1135 = dma.done.wait (%p1265_p4), %s327_s23, 2048  }
  0x31   : > { %1137 = vsyncadd (%p1265_p4), %s327_s23, 4294965248 }
  0x32   : > { %1139 = dma.done.wait (%p1255_p1), [#allocation7], 512  }
  0x33   : > { %1141 = vsyncadd (%p1255_p1), [#allocation7], 4294966784 }
  0x34   : > { %1143 = dma.done.wait (%p1255_p1), [#allocation10], 256  }
  0x35   : > { %1145 = vsyncadd (%p1255_p1), [#allocation10], 4294967040  ;;  %vm395_vm0 = vcmask 523264   ;;  %v379_v0 = vld [vmem:[%s1340_s13] sm:$0xff]  ;;  %v381_v7 = vld [vmem:[%s1340_s13 + $0x10] sm:$0xff]  ;;  %v444_v50 = vlaneseq  ;;  %vm449_vm1 = vcmask 130112   ;;  %s699_s15 = scalar_lea.hbm %s1448_s7, %s1164_s27 }
  0x36   : > { %v383_v1 = vld [vmem:[%s1340_s13 + $0x20] sm:$0xff]  ;;  %v396_v4 = vsel %vm395_vm0, %v379_v0, 0.0  ;;  %v385_v8 = vld [vmem:[%s1340_s13 + $0x30] sm:$0xff]  ;;  %v410_v12 = vsel %vm395_vm0, %v381_v7, 0.0  ;;  %v380_v14 = vld [vmem:[%s1340_s13 + $0x8] sm:$0xff]  ;;  %vm453_vm2 = vcmask 195712  }
  0x37   : > { %v387_v2 = vld [vmem:[%s1340_s13 + $0x40] sm:$0xff]  ;;  %v397_v5 = vsel %vm395_vm0, %v383_v1, 0.0  ;;  %v389_v10 = vld [vmem:[%s1340_s13 + $0x50] sm:$0xff]  ;;  %v411_v13 = vsel %vm395_vm0, %v385_v8, 0.0  ;;  %v384_v18 = vld [vmem:[%s1340_s13 + $0x28] sm:$0xff]  ;;  %v403_v21 = vsel %vm395_vm0, %v380_v14, 0.0 }
  0x38   : > { %v391_v3 = vld [vmem:[%s1340_s13 + $0x60] sm:$0xff]  ;;  %v399_v6 = vsel %vm395_vm0, %v387_v2, 0.0  ;;  %v398_v9 = vadd.f32 %v397_v5, %v396_v4  ;;  %v393_v11 = vld [vmem:[%s1340_s13 + $0x70] sm:$0xff]  ;;  %v412_v16 = vadd.f32 %v411_v13, %v410_v12  ;;  %v413_v17 = vsel %vm395_vm0, %v389_v10, 0.0  ;;  %v388_v19 = vld [vmem:[%s1340_s13 + $0x48] sm:$0xff]  ;;  %s375_s14 = scalar_lea.vmem [#allocation11], %s1336_s18 }
  0x39   : > { %v401_v15 = vsel %vm395_vm0, %v391_v3, 0.0  ;;  %v392_v20 = vld [vmem:[%s1340_s13 + $0x68] sm:$0xff]  ;;  %v415_v23 = vsel %vm395_vm0, %v393_v11, 0.0  ;;  %v404_v24 = vsel %vm395_vm0, %v384_v18, 0.0  ;;  %v406_v25 = vsel %vm395_vm0, %v388_v19, 0.0  ;;  %v382_v26 = vld [vmem:[%s1340_s13 + $0x18] sm:$0xff] }
  0x3a   : > { %v400_v22 = vadd.f32 %v399_v6, %v398_v9  ;;  %v386_v27 = vld [vmem:[%s1340_s13 + $0x38] sm:$0xff]  ;;  %v414_v29 = vadd.f32 %v413_v17, %v412_v16  ;;  %v405_v30 = vadd.f32 %v404_v24, %v403_v21  ;;  %v417_v32 = vsel %vm395_vm0, %v382_v26, 0.0  ;;  %v860_v48 = vld [vmem:[#allocation6 + $0x8] sm:$0xff]  ;;  %v859_v49 = vld [vmem:[#allocation6] sm:$0xff]  ;;  %s701_s17 = sshll.u32 %s375_s14, 4  ;;  %s703_s20 = sshll.u32 %s699_s15, 4  ;;  %s702_s17 = int_to_ptr.vmem [resolvable:$true] %s701_s17  ;;  %s704_s20 = int_to_ptr.hbm [resolvable:$true] %s703_s20 }
  0x3b   : > { %v390_v28 = vld [vmem:[%s1340_s13 + $0x58] sm:$0xff]  ;;  %v418_v33 = vsel %vm395_vm0, %v386_v27, 0.0  ;;  %v408_v39 = vsel %vm395_vm0, %v392_v20, 0.0  ;;  %613 = vmatpush.bf16.msra.mxu0 %v860_v48  ;;  %v445_v53 = vand.u32 127, %v444_v50  ;;  %vm457_vm3 = vcmask 261312   ;;  %v861_v7 = vld [vmem:[#allocation8] sm:$0xff] }
  0x3c   : > { %v394_v31 = vld [vmem:[%s1340_s13 + $0x78] sm:$0xff]  ;;  %v402_v34 = vadd.f32 %v401_v15, %v400_v22  ;;  %v419_v35 = vadd.f32 %v418_v33, %v417_v32  ;;  %v420_v36 = vsel %vm395_vm0, %v390_v28, 0.0  ;;  %v416_v37 = vadd.f32 %v415_v23, %v414_v29  ;;  %v864_v8 = vld [vmem:[#allocation9 + $0x8] sm:$0xff]  ;;  %v863_v15 = vld [vmem:[#allocation9] sm:$0xff]  ;;  %s691_s21 = scalar_lea.sflag [#allocation5], %s1336_s18  ;;  %s1096_s10 = sshra.s32 %s704_s20, 4  ;;  %s1097_s10 = int_to_ptr.hbm [resolvable:$true] %s1096_s10 }
  0x3d   : > { %v407_v38 = vadd.f32 %v406_v25, %v405_v30  ;;  %v422_v42 = vsel %vm395_vm0, %v394_v31, 0.0  ;;  %v447_v54 = vadd.s32 4294967288, %v445_v53  ;;  %v451_v55 = vadd.s32 4294967280, %v445_v53  ;;  %v862_v6 = vld [vmem:[#allocation8 + $0x8] sm:$0xff]  ;;  %682 = vmatpush.bf16.msra.mxu2 %v864_v8  ;;  %s1098_s19 = scalar_lea.hbm %s1097_s10, 1  ;;  %s1102_s13 = scalar_lea.hbm %s1448_s7, 2 }
  0x3e   : > { %v424_v40 = vsel %vm395_vm0, %v402_v34, 0.0  ;;  %v421_v41 = vadd.f32 %v420_v36, %v419_v35  ;;  %v430_v43 = vsel %vm395_vm0, %v416_v37, 0.0  ;;  %v455_v56 = vadd.s32 4294967272, %v445_v53  ;;  %648 = vmatpush.bf16.msra.mxu1 %v862_v6  ;;  %v590_v9 = vld [vmem:[%s1443_s2] sm:$0x1]  ;;  %p1099_p1 = scmp.ne.s32.totalorder %s1097_s10, %s1098_s19  ;;  %p1103_p10 = scmp.lt.s32.totalorder %s1097_s10, %s1448_s7 }
  0x3f   : > { %425 = vadd.xlane.f32.xlu0 %v424_v40  ;;  %431 = vadd.xlane.f32.xlu1 %v430_v43  ;;  %v409_v44 = vadd.f32 %v408_v39, %v407_v38  ;;  %vm460_vm4 = vcmask 253952   ;;  %vm603_vm5 = vcmask 261120   ;;  %v626_v16 = vld [vmem:[%s1445_s4] sm:$0x1]  ;;  %p1104_p12 = scmp.lt.s32.totalorder %s1102_s13, %s1098_s19 }
  0x40   : > { %v423_v45 = vadd.f32 %v422_v42, %v421_v41  ;;  %614 = vmatpush.bf16.msra.mxu0 %v859_v49  ;;  %v660_v21 = vld [vmem:[%s1447_s6] sm:$0x1]  ;;  %p1100_p4 = pnand %p1099_p1, %p1316_p5 }
  0x41   : > { %v427_v46 = vsel %vm395_vm0, %v409_v44, 0.0  ;;  %683 = vmatpush.bf16.msra.mxu2 %v863_v15  ;;  %p1105_p13 = por %p1104_p12, %p1103_p10 }
  0x42   : > { %v433_v47 = vsel %vm395_vm0, %v423_v45, 0.0  ;;  %649 = vmatpush.bf16.msra.mxu1 %v861_v7  ;;  %p1101_p8 = pneg %p1100_p4 }
  0x44   : > { %p1106_p0 = pnand %p1105_p13, %p1101_p8 }
  0x47   : > { %428 = vadd.xlane.f32.xlu0 %v427_v46  ;;  %434 = vadd.xlane.f32.xlu1 %v433_v47 }
  0xb2   : > { %v426_v51 = vpop.xlane.xlu0 %425  ;;  %v432_v52 = vpop.xlane.xlu1 %431 }
  0xb3   : > { %v446_v58 = vperm.slane %v426_v51, %v445_v53  ;;  %v452_v61 = vperm.slane %v432_v52, %v451_v55 }
  0xba   : > { %v429_v57 = vpop.xlane.xlu0 %428  ;;  %v435_v60 = vpop.xlane.xlu1 %434 }
  0xbb   : > { %v448_v59 = vperm.slane %v429_v57, %v447_v54  ;;  %v456_v62 = vperm.slane %v435_v60, %v455_v56 }
  0xbd   : > { %v450_v63 = vsel %vm449_vm1, %v448_v59, %v446_v58 }
  0xbe   : > { %v454_v0 = vsel %vm453_vm2, %v452_v61, %v450_v63 }
  0xbf   : > { %v458_v1 = vsel %vm457_vm3, %v456_v62, %v454_v0 }
  0xc0   : > { %461 = vst.msk [vmem:[#allocation2] sm:$0x1] %vm460_vm4, %v458_v1 }
  0xc7   : > { %v582_v2 = vld [vmem:[#allocation2] sm:$0x1] }
  0xc8   : > { %v583_v3 = vmul.f32 0.00390625, %v582_v2 }
  0xca   : > { %v584_v4 = vmax.f32 %v583_v3, 0.0 }
  0xcc   : > { %v585_v5 = vpack.c.bf16 %v584_v4, %v584_v4 }
  0xce   : > { %837 = vmatmul.msk.bf16.vlgmr.msra.gmra.mxu0 %vm603_vm5, %v585_v5 }
 0x14b   : > { %v616_v10 = vpop.f32.mrf.mxu0 }
 0x14c   : > { %v617_v11 = vadd.f32 %v616_v10, %v590_v9 }
 0x14e   : > { %v620_v12 = vmax.f32 %v617_v11, 0.0 }
 0x150   : > { %v621_v13 = vpack.c.bf16 %v620_v12, %v620_v12 }
 0x152   : > { %846 = vmatmul.msk.bf16.vlgmr.msra.gmra.mxu1 %vm603_vm5, %v621_v13 }
 0x153   : > { %v618_v14 = vpop.f32.mrf.mxu0 }
 0x1cf   : > { %v651_v17 = vpop.f32.mrf.mxu1 }
 0x1d0   : > { %v652_v18 = vadd.f32 %v651_v17, %v626_v16 }
 0x1d2   : > { %v655_v19 = vpack.c.bf16 %v652_v18, %v652_v18 }
 0x1d4   : > { %855 = vmatmul.msk.bf16.vlgmr.msra.gmra.mxu2 %vm603_vm5, %v655_v19 }
 0x1d7   : > { %v653_v20 = vpop.f32.mrf.mxu1 }
 0x257   : > { %v685_v22 = vpop.f32.mrf.mxu2 }
 0x258   : > { %v686_v23 = vadd.f32 %v685_v22, %v660_v21 }
 0x25a   : > { %689 = vst [vmem:[%s375_s14] sm:$0x1] %v686_v23 }
 0x25b   : > { %1109 = shalt.err (!%p1106_p0)
}
 0x25c   : > { %879 = dma.vmem_to_hbm [thread:$0]  (%p1316_p5), %s702_s17, 16, %s704_s20, %s691_s21  }
 0x25f   : > { %v687_v24 = vpop.f32.mrf.mxu2 }
 0x260 PF: > { %s1468_s18 = sld [smem:[#allocation16_spill]]  ;;  %s715_s29 = sand.u32 1, %s1152_s24  }
 0x261   : > { %p896_p3 = pnand %p820_p11, %p1270_p6  ;;  %s716_s9 = scalar_lea.sflag [#allocation5], %s715_s29 }
 0x263   : > { %p897_p7 = pneg %p896_p3 }
 0x265   : > { %1147 = dma.done.wait (%p897_p7), %s716_s9, 16  }
 0x266   : > { %1149 = vsyncadd (%p897_p7), %s716_s9, 4294967280  ;;  %s25_s29 = sadd.s32 1, %s1468_s18   ;;  %s1469_s22 = sld [smem:[#allocation17_spill]] }
 0x267   : > { %p22_p9 = scmp.ge.s32.totalorder %s25_s29, 4   ;;  %s1470_s24 = smov %s1156_s25 }
 0x268   : > { %s1471_s25 = smov %s1160_s26  ;;  %s1472_s26 = smov %s1325_s30 }
 0x269   : > { %s1473_s27 = smov %s1168_s28  ;;  %24 = sbr.rel (!%p22_p9) target bundleno = 12 (0xc), region = 124 }
 0x26c   : > { %s1474_s28 = smov %s1469_s22 }
 0x26e   :  { %721 = vsyncpa [#allocation4], 1 }
 0x26f   :  { %723 = vsyncpa [#allocation4 + $0x1], 1 }
 0x270   :  { %724 = vsyncpa [#allocation7], 1 }
 0x271   :  { %725 = vsyncpa [#allocation10], 1 }
 0x272   :  { %726 = vsyncpa [#allocation5], 1 }
 0x273   :  { %728 = vsyncpa [#allocation5 + $0x1], 1 }

// kernel: tpu_custom_call.1
= control target key start
LH: loop header
LB: loop body
LE: loop exit
PB: predicated region body
PF: predicated region fallthrough
CT: control target
= control target key end

     0   :  { %s1441_s0 = inlined_call_operand.hbm [shape: f32[2,4,32,64], index: 0, kind: input, shape index: {}]   ;;  %s1442_s1 = inlined_call_operand.hbm [shape: bf16[32,32], index: 1, kind: input, shape index: {}]   ;;  %s1443_s2 = inlined_call_operand.vmem [shape: f32[1,32], index: 2, kind: input, shape index: {}]   ;;  %s1444_s3 = inlined_call_operand.hbm [shape: bf16[32,32], index: 3, kind: input, shape index: {}]   ;;  %s1445_s4 = inlined_call_operand.vmem [shape: f32[1,32], index: 4, kind: input, shape index: {}]   ;;  %s1446_s5 = inlined_call_operand.hbm [shape: bf16[32,128], index: 5, kind: input, shape index: {}]   ;;  %s1447_s6 = inlined_call_operand.vmem [shape: f32[1,128], index: 6, kind: input, shape index: {}]   ;;  %s1448_s7 = inlined_call_operand.hbm [shape: f32[2,1,128], index: 7, kind: output, shape index: {}]  }
   0x1   :  { %1452 = sst [smem:[#allocation18_spill]] %s1442_s1 }
   0x2   :  { %1453 = sst [smem:[#allocation19_spill]] %s1444_s3 }
   0x3   :  { %1454 = sst [smem:[#allocation20_spill]] %s1446_s5 }
   0x4   :  { %12 = vsyncpa [#allocation4], 0 }
   0x5   :  { %14 = vsyncpa [#allocation4 + $0x1], 0 }
   0x6   :  { %15 = vsyncpa [#allocation7], 0 }
   0x7   :  { %16 = vsyncpa [#allocation10], 0 }
   0x8   :  { %17 = vsyncpa [#allocation5], 0 }
   0x9   :  { %19 = vsyncpa [#allocation5 + $0x1], 0  ;;  %s1221_s24 = smov 0   ;;  %s1223_s25 = smov 0  }
   0xa   :  { %s1225_s26 = smov 0   ;;  %s1227_s27 = smov 0  }
   0xb   :  { %s1229_s28 = smov 0   ;;  %s1231_s29 = smov 0  }
   0xc LB: > { %1455 = sst [smem:[#allocation16_spill]] %s1172_s29  ;;  %s814_s30 = sadd.s32 4294967295, %s1172_s29   ;;  %s1172_s29 = sphi %s1231_s29, %s25_s29   ;;  %s1168_s28 = sphi %s1229_s28, %s1474_s28   ;;  %s1164_s27 = sphi %s1227_s27, %s1473_s27   ;;  %s1160_s26 = sphi %s1225_s26, %s1472_s26   ;;  %s1156_s25 = sphi %s1223_s25, %s1471_s25   ;;  %s1152_s24 = sphi %s1221_s24, %s1470_s24  }
   0xd   : > { %s815_s8 = sadd.s32 4294967294, %s1172_s29   ;;  %p68_p0 = scmp.ne.s32.totalorder %s1156_s25, %s1152_s24 }
   0xe   : > { %p1255_p1 = scmp.eq.s32.totalorder %s814_s30, 0  ;;  %p1259_p2 = scmp.eq.s32.totalorder %s814_s30, 1 }
   0xf   : > { %p224_p3 = scmp.eq.s32.totalorder %s815_s8, 1  ;;  %p816_p5 = scmp.ge.s32.totalorder %s1172_s29, 1 }
  0x10   : > { %p1265_p4 = por %p1255_p1, %p68_p0  ;;  %p231_p7 = scmp.lt.s32.totalorder %s1172_s29, 3 }
  0x11   : > { %p1270_p6 = por %p224_p3, %p68_p0  ;;  %s1460_s1 = sld [smem:[#allocation18_spill]] }
  0x12   : > { %p1278_p8 = pnand %p816_p5, %p231_p7  ;;  %s1174_s17 = smov [#allocation6]  }
  0x13   : > { %s244_s18 = sshll.u32 %s1174_s17, 4  ;;  %p820_p11 = scmp.ge.s32.totalorder %s1172_s29, 2  ;;  %s245_s18 = int_to_ptr.vmem [resolvable:$true] %s244_s18 }
  0x14   : > { %p881_p9 = pneg %p1278_p8  ;;  %s1463_s3 = sld [smem:[#allocation19_spill]] }
  0x15   : > { %s1175_s23 = smov 64   ;;  %s1176_s30 = smov 4  }
  0x16   : > { %p1286_p10 = pnand %p881_p9, %p1255_p1  ;;  %s1177_s8 = smov [#allocation8]  }
  0x17   : > { %s242_s15 = sshll.u32 %s1460_s1, 4  ;;  %s261_s13 = sshll.u32 %s1177_s8, 4  ;;  %s243_s15 = int_to_ptr.hbm [resolvable:$true] %s242_s15  ;;  %s262_s13 = int_to_ptr.vmem [resolvable:$true] %s261_s13 }
  0x18   : > { %884 = dma.hbm_to_vmem [thread:$0]  (!%p1286_p10), %s243_s15, 256, %s245_s18, [#allocation7], %s1175_s23, %s1175_s23, %s1176_s30  }
  0x19   : > { %s1464_s5 = sld [smem:[#allocation20_spill]]  ;;  %s1178_s20 = smov [#allocation9]  }
  0x1a   : > { %s259_s22 = sshll.u32 %s1463_s3, 4  ;;  %s278_s21 = sshll.u32 %s1178_s20, 4  ;;  %s260_s22 = int_to_ptr.hbm [resolvable:$true] %s259_s22  ;;  %s279_s21 = int_to_ptr.vmem [resolvable:$true] %s278_s21 }
  0x1b   : > { %887 = dma.hbm_to_vmem [thread:$0]  (!%p1286_p10), %s260_s22, 256, %s262_s13, [#allocation7], %s1175_s23, %s1175_s23, %s1176_s30  }
  0x1c   : > { %s44_s15 = sadd.s32 1, %s1168_s28  ;;  %s55_s18 = sadd.s32 1, %s1160_s26 }
  0x1d   : > { %p46_p12 = scmp.ge.s32.totalorder %s44_s15, 2  ;;  %p62_p13 = scmp.ne.s32.totalorder %s1160_s26, %s1156_s25 }
  0x1e   : > { %p63_p0 = scmp.eq.s32.totalorder %s1172_s29, 0  ;;  %p902_p7 = scmp.lt.s32.totalorder %s1172_s29, 2 }
  0x1f   : > { %s276_s1 = sshll.u32 %s1464_s5, 4  ;;  %s1476_s15 = smov (%p46_p12, %s44_s15), 0  ;;  %s277_s1 = int_to_ptr.hbm [resolvable:$true] %s276_s1 }
  0x20   : > { %890 = dma.hbm_to_vmem [thread:$0]  (!%p1286_p10), %s277_s1, 256, %s279_s21, [#allocation10], %s1175_s23, %s1175_s23, %s1176_s30  }
  0x21   : > { %1465 = sst [smem:[#allocation17_spill]] %s1476_s15  ;;  %p1310_p3 = por %p63_p0, %p62_p13 }
  0x22   : > { %p1316_p5 = por %p1259_p2, %p62_p13  ;;  %s48_s19 = ssub.s32 %s1168_s28, %s1476_s15 }
  0x23   : > { %p53_p9 = scmp.eq.s32.totalorder %s48_s19, 0  ;;  %s295_s1 = sand.u32 1, %s1160_s26  }
  0x24   : > { %s821_s23 = sshll.u32 %s295_s1, 7  ;;  %s858_s13 = sshll.u32 %s1168_s28, 7 }
  0x25   : > { %s1325_s30 = scalar_select %p53_p9, %s1160_s26, %s55_s18  }
  0x26   : > { %s309_s20 = scalar_lea.hbm %s1441_s0, %s858_s13  ;;  %s299_s21 = scalar_lea.vmem [#allocation3], %s821_s23 }
  0x27   : > { %s312_s3 = sshll.u32 %s299_s21, 4  ;;  %s310_s10 = sshll.u32 %s309_s20, 4  ;;  %s313_s3 = int_to_ptr.vmem [resolvable:$true] %s312_s3  ;;  %s311_s10 = int_to_ptr.hbm [resolvable:$true] %s310_s10 }
  0x28   : > { %p892_p2 = pnand %p902_p7, %p1310_p3  ;;  %s296_s5 = scalar_lea.sflag [#allocation4], %s295_s1 }
  0x29   : > { %s1179_s15 = smov 128   ;;  %s1180_s29 = smov 8  }
  0x2a   : > { %894 = dma.hbm_to_vmem [thread:$0]  (!%p892_p2), %s311_s10, 2048, %s313_s3, %s296_s5, %s1179_s15, %s1179_s15, %s1180_s29  }
  0x2b   : > { %324 = sbr.rel (%p1278_p8) target bundleno = 608 (0x260), region = 48  ;;  %s1336_s18 = sand.u32 (!%p1278_p8), 1, %s1156_s25  }
  0x2c   : > { %s825_s19 = sshll.u32 (!%p1278_p8), %s1336_s18, 7  ;;  %s327_s23 = scalar_lea.sflag (!%p1278_p8), [#allocation4], %s1336_s18 }
  0x2d   : > { %s1340_s13 = scalar_lea.vmem (!%p1278_p8), [#allocation3], %s825_s19 }
  0x30   : > { %1135 = dma.done.wait (%p1265_p4), %s327_s23, 2048  }
  0x31   : > { %1137 = vsyncadd (%p1265_p4), %s327_s23, 4294965248 }
  0x32   : > { %1139 = dma.done.wait (%p1255_p1), [#allocation7], 512  }
  0x33   : > { %1141 = vsyncadd (%p1255_p1), [#allocation7], 4294966784 }
  0x34   : > { %1143 = dma.done.wait (%p1255_p1), [#allocation10], 256  }
  0x35   : > { %1145 = vsyncadd (%p1255_p1), [#allocation10], 4294967040  ;;  %vm395_vm0 = vcmask 523264   ;;  %v379_v0 = vld [vmem:[%s1340_s13] sm:$0xff]  ;;  %v381_v7 = vld [vmem:[%s1340_s13 + $0x10] sm:$0xff]  ;;  %v444_v50 = vlaneseq  ;;  %vm449_vm1 = vcmask 130112   ;;  %s699_s15 = scalar_lea.hbm %s1448_s7, %s1164_s27 }
  0x36   : > { %v383_v1 = vld [vmem:[%s1340_s13 + $0x20] sm:$0xff]  ;;  %v396_v4 = vsel %vm395_vm0, %v379_v0, 0.0  ;;  %v385_v8 = vld [vmem:[%s1340_s13 + $0x30] sm:$0xff]  ;;  %v410_v12 = vsel %vm395_vm0, %v381_v7, 0.0  ;;  %v380_v14 = vld [vmem:[%s1340_s13 + $0x8] sm:$0xff]  ;;  %vm453_vm2 = vcmask 195712  }
  0x37   : > { %v387_v2 = vld [vmem:[%s1340_s13 + $0x40] sm:$0xff]  ;;  %v397_v5 = vsel %vm395_vm0, %v383_v1, 0.0  ;;  %v389_v10 = vld [vmem:[%s1340_s13 + $0x50] sm:$0xff]  ;;  %v411_v13 = vsel %vm395_vm0, %v385_v8, 0.0  ;;  %v384_v18 = vld [vmem:[%s1340_s13 + $0x28] sm:$0xff]  ;;  %v403_v21 = vsel %vm395_vm0, %v380_v14, 0.0 }
  0x38   : > { %v391_v3 = vld [vmem:[%s1340_s13 + $0x60] sm:$0xff]  ;;  %v399_v6 = vsel %vm395_vm0, %v387_v2, 0.0  ;;  %v398_v9 = vadd.f32 %v397_v5, %v396_v4  ;;  %v393_v11 = vld [vmem:[%s1340_s13 + $0x70] sm:$0xff]  ;;  %v412_v16 = vadd.f32 %v411_v13, %v410_v12  ;;  %v413_v17 = vsel %vm395_vm0, %v389_v10, 0.0  ;;  %v388_v19 = vld [vmem:[%s1340_s13 + $0x48] sm:$0xff]  ;;  %s375_s14 = scalar_lea.vmem [#allocation11], %s1336_s18 }
  0x39   : > { %v401_v15 = vsel %vm395_vm0, %v391_v3, 0.0  ;;  %v392_v20 = vld [vmem:[%s1340_s13 + $0x68] sm:$0xff]  ;;  %v415_v23 = vsel %vm395_vm0, %v393_v11, 0.0  ;;  %v404_v24 = vsel %vm395_vm0, %v384_v18, 0.0  ;;  %v406_v25 = vsel %vm395_vm0, %v388_v19, 0.0  ;;  %v382_v26 = vld [vmem:[%s1340_s13 + $0x18] sm:$0xff] }
  0x3a   : > { %v400_v22 = vadd.f32 %v399_v6, %v398_v9  ;;  %v386_v27 = vld [vmem:[%s1340_s13 + $0x38] sm:$0xff]  ;;  %v414_v29 = vadd.f32 %v413_v17, %v412_v16  ;;  %v405_v30 = vadd.f32 %v404_v24, %v403_v21  ;;  %v417_v32 = vsel %vm395_vm0, %v382_v26, 0.0  ;;  %v860_v48 = vld [vmem:[#allocation6 + $0x8] sm:$0xff]  ;;  %v859_v49 = vld [vmem:[#allocation6] sm:$0xff]  ;;  %s701_s17 = sshll.u32 %s375_s14, 4  ;;  %s703_s20 = sshll.u32 %s699_s15, 4  ;;  %s702_s17 = int_to_ptr.vmem [resolvable:$true] %s701_s17  ;;  %s704_s20 = int_to_ptr.hbm [resolvable:$true] %s703_s20 }
  0x3b   : > { %v390_v28 = vld [vmem:[%s1340_s13 + $0x58] sm:$0xff]  ;;  %v418_v33 = vsel %vm395_vm0, %v386_v27, 0.0  ;;  %v408_v39 = vsel %vm395_vm0, %v392_v20, 0.0  ;;  %613 = vmatpush.bf16.msra.mxu0 %v860_v48  ;;  %v445_v53 = vand.u32 127, %v444_v50  ;;  %vm457_vm3 = vcmask 261312   ;;  %v861_v7 = vld [vmem:[#allocation8] sm:$0xff] }
  0x3c   : > { %v394_v31 = vld [vmem:[%s1340_s13 + $0x78] sm:$0xff]  ;;  %v402_v34 = vadd.f32 %v401_v15, %v400_v22  ;;  %v419_v35 = vadd.f32 %v418_v33, %v417_v32  ;;  %v420_v36 = vsel %vm395_vm0, %v390_v28, 0.0  ;;  %v416_v37 = vadd.f32 %v415_v23, %v414_v29  ;;  %v864_v8 = vld [vmem:[#allocation9 + $0x8] sm:$0xff]  ;;  %v863_v15 = vld [vmem:[#allocation9] sm:$0xff]  ;;  %s691_s21 = scalar_lea.sflag [#allocation5], %s1336_s18  ;;  %s1096_s10 = sshra.s32 %s704_s20, 4  ;;  %s1097_s10 = int_to_ptr.hbm [resolvable:$true] %s1096_s10 }
  0x3d   : > { %v407_v38 = vadd.f32 %v406_v25, %v405_v30  ;;  %v422_v42 = vsel %vm395_vm0, %v394_v31, 0.0  ;;  %v447_v54 = vadd.s32 4294967288, %v445_v53  ;;  %v451_v55 = vadd.s32 4294967280, %v445_v53  ;;  %v862_v6 = vld [vmem:[#allocation8 + $0x8] sm:$0xff]  ;;  %682 = vmatpush.bf16.msra.mxu2 %v864_v8  ;;  %s1098_s19 = scalar_lea.hbm %s1097_s10, 1  ;;  %s1102_s13 = scalar_lea.hbm %s1448_s7, 2 }
  0x3e   : > { %v424_v40 = vsel %vm395_vm0, %v402_v34, 0.0  ;;  %v421_v41 = vadd.f32 %v420_v36, %v419_v35  ;;  %v430_v43 = vsel %vm395_vm0, %v416_v37, 0.0  ;;  %v455_v56 = vadd.s32 4294967272, %v445_v53  ;;  %648 = vmatpush.bf16.msra.mxu1 %v862_v6  ;;  %v590_v9 = vld [vmem:[%s1443_s2] sm:$0x1]  ;;  %p1099_p1 = scmp.ne.s32.totalorder %s1097_s10, %s1098_s19  ;;  %p1103_p10 = scmp.lt.s32.totalorder %s1097_s10, %s1448_s7 }
  0x3f   : > { %425 = vadd.xlane.f32.xlu0 %v424_v40  ;;  %431 = vadd.xlane.f32.xlu1 %v430_v43  ;;  %v409_v44 = vadd.f32 %v408_v39, %v407_v38  ;;  %vm460_vm4 = vcmask 253952   ;;  %vm603_vm5 = vcmask 261120   ;;  %v626_v16 = vld [vmem:[%s1445_s4] sm:$0x1]  ;;  %p1104_p12 = scmp.lt.s32.totalorder %s1102_s13, %s1098_s19 }
  0x40   : > { %v423_v45 = vadd.f32 %v422_v42, %v421_v41  ;;  %614 = vmatpush.bf16.msra.mxu0 %v859_v49  ;;  %v660_v21 = vld [vmem:[%s1447_s6] sm:$0x1]  ;;  %p1100_p4 = pnand %p1099_p1, %p1316_p5 }
  0x41   : > { %v427_v46 = vsel %vm395_vm0, %v409_v44, 0.0  ;;  %683 = vmatpush.bf16.msra.mxu2 %v863_v15  ;;  %p1105_p13 = por %p1104_p12, %p1103_p10 }
  0x42   : > { %v433_v47 = vsel %vm395_vm0, %v423_v45, 0.0  ;;  %649 = vmatpush.bf16.msra.mxu1 %v861_v7  ;;  %p1101_p8 = pneg %p1100_p4 }
  0x44   : > { %p1106_p0 = pnand %p1105_p13, %p1101_p8 }
  0x47   : > { %428 = vadd.xlane.f32.xlu0 %v427_v46  ;;  %434 = vadd.xlane.f32.xlu1 %v433_v47 }
  0xb2   : > { %v426_v51 = vpop.xlane.xlu0 %425  ;;  %v432_v52 = vpop.xlane.xlu1 %431 }
  0xb3   : > { %v446_v58 = vperm.slane %v426_v51, %v445_v53  ;;  %v452_v61 = vperm.slane %v432_v52, %v451_v55 }
  0xba   : > { %v429_v57 = vpop.xlane.xlu0 %428  ;;  %v435_v60 = vpop.xlane.xlu1 %434 }
  0xbb   : > { %v448_v59 = vperm.slane %v429_v57, %v447_v54  ;;  %v456_v62 = vperm.slane %v435_v60, %v455_v56 }
  0xbd   : > { %v450_v63 = vsel %vm449_vm1, %v448_v59, %v446_v58 }
  0xbe   : > { %v454_v0 = vsel %vm453_vm2, %v452_v61, %v450_v63 }
  0xbf   : > { %v458_v1 = vsel %vm457_vm3, %v456_v62, %v454_v0 }
  0xc0   : > { %461 = vst.msk [vmem:[#allocation2] sm:$0x1] %vm460_vm4, %v458_v1 }
  0xc7   : > { %v582_v2 = vld [vmem:[#allocation2] sm:$0x1] }
  0xc8   : > { %v583_v3 = vmul.f32 0.00390625, %v582_v2 }
  0xca   : > { %v584_v4 = vmax.f32 %v583_v3, 0.0 }
  0xcc   : > { %v585_v5 = vpack.c.bf16 %v584_v4, %v584_v4 }
  0xce   : > { %837 = vmatmul.msk.bf16.vlgmr.msra.gmra.mxu0 %vm603_vm5, %v585_v5 }
 0x14b   : > { %v616_v10 = vpop.f32.mrf.mxu0 }
 0x14c   : > { %v617_v11 = vadd.f32 %v616_v10, %v590_v9 }
 0x14e   : > { %v620_v12 = vmax.f32 %v617_v11, 0.0 }
 0x150   : > { %v621_v13 = vpack.c.bf16 %v620_v12, %v620_v12 }
 0x152   : > { %846 = vmatmul.msk.bf16.vlgmr.msra.gmra.mxu1 %vm603_vm5, %v621_v13 }
 0x153   : > { %v618_v14 = vpop.f32.mrf.mxu0 }
 0x1cf   : > { %v651_v17 = vpop.f32.mrf.mxu1 }
 0x1d0   : > { %v652_v18 = vadd.f32 %v651_v17, %v626_v16 }
 0x1d2   : > { %v655_v19 = vpack.c.bf16 %v652_v18, %v652_v18 }
 0x1d4   : > { %855 = vmatmul.msk.bf16.vlgmr.msra.gmra.mxu2 %vm603_vm5, %v655_v19 }
 0x1d7   : > { %v653_v20 = vpop.f32.mrf.mxu1 }
 0x257   : > { %v685_v22 = vpop.f32.mrf.mxu2 }
 0x258   : > { %v686_v23 = vadd.f32 %v685_v22, %v660_v21 }
 0x25a   : > { %689 = vst [vmem:[%s375_s14] sm:$0x1] %v686_v23 }
 0x25b   : > { %1109 = shalt.err (!%p1106_p0)
}
 0x25c   : > { %879 = dma.vmem_to_hbm [thread:$0]  (%p1316_p5), %s702_s17, 16, %s704_s20, %s691_s21  }
 0x25f   : > { %v687_v24 = vpop.f32.mrf.mxu2 }
 0x260 PF: > { %s1468_s18 = sld [smem:[#allocation16_spill]]  ;;  %s715_s29 = sand.u32 1, %s1152_s24  }
 0x261   : > { %p896_p3 = pnand %p820_p11, %p1270_p6  ;;  %s716_s9 = scalar_lea.sflag [#allocation5], %s715_s29 }
 0x263   : > { %p897_p7 = pneg %p896_p3 }
 0x265   : > { %1147 = dma.done.wait (%p897_p7), %s716_s9, 16  }
 0x266   : > { %1149 = vsyncadd (%p897_p7), %s716_s9, 4294967280  ;;  %s25_s29 = sadd.s32 1, %s1468_s18   ;;  %s1469_s22 = sld [smem:[#allocation17_spill]] }
 0x267   : > { %p22_p9 = scmp.ge.s32.totalorder %s25_s29, 4   ;;  %s1470_s24 = smov %s1156_s25 }
 0x268   : > { %s1471_s25 = smov %s1160_s26  ;;  %s1472_s26 = smov %s1325_s30 }
 0x269   : > { %s1473_s27 = smov %s1168_s28  ;;  %24 = sbr.rel (!%p22_p9) target bundleno = 12 (0xc), region = 124 }
 0x26c   : > { %s1474_s28 = smov %s1469_s22 }
 0x26e   :  { %721 = vsyncpa [#allocation4], 1 }
 0x26f   :  { %723 = vsyncpa [#allocation4 + $0x1], 1 }
 0x270   :  { %724 = vsyncpa [#allocation7], 1 }
 0x271   :  { %725 = vsyncpa [#allocation10], 1 }
 0x272   :  { %726 = vsyncpa [#allocation5], 1 }
 0x273   :  { %728 = vsyncpa [#allocation5 + $0x1], 1 }

</bundles_post_ra>
